<compile_context>
chip_gen: v6e
topology: v6e:2x2x1
jax: 0.10.0
libtpu: 0.0.40
codegen_flags: <defaults>
</compile_context>

<pallas_src>
import jax
import jax.numpy as jnp
from jax import lax
from jax.experimental import pallas as pl
from jax.experimental.pallas import tpu as pltpu


def _round_up(x, m):
    return ((x + m - 1) // m) * m


def _choose_batch_tile(B, cap):
    """Lane-aligned batch tile: as large as the cap allows, but always >= 2
    tiles when the batch permits it, so the parallel grid axis can shard across
    both v7x TensorCores instead of serializing on one TC."""
    cap = max(128, _round_up(cap, 128))
    b128 = _round_up(B, 128)
    half = max(128, _round_up((b128 + 1) // 2, 128))
    return min(cap, half)


def convnet_kernel(x_ref,                # VMEM (TB, H)   natural batch-major block
                   w1T_ref, b1_ref,      # VMEM (win, H), (win, 1)   conv folded in
                   w2T_ref, b2_ref,      # VMEM (win//2, win), (win//2, 1)
                   w3T_ref, b3_ref,      # VMEM (win//4, win//2), (win//4, 1)
                   w4T_ref, b4_ref,      # VMEM (3, win//4), (3, 1)
                   out_ref):             # VMEM (3, TB)   lane-dense
    # Layer 1 contracts x's feature axis directly (w1T @ x^T), so the wrapper
    # never transposes/pads the input in HBM; the on-chip relayout of the
    # (TB, H) tile rides the XLU/MXU, which have slack in this kernel.
    h1 = jnp.maximum(
        lax.dot_general(w1T_ref[...], x_ref[...],
                        (((1,), (1,)), ((), ())),
                        preferred_element_type=jnp.float32)
        + b1_ref[...], 0.0)                                               # (win, TB)
    h2 = jnp.maximum(
        jnp.dot(w2T_ref[...], h1, preferred_element_type=jnp.float32)
        + b2_ref[...], 0.0)                                               # (win/2, TB)
    # NOTE: if a bundle dump ever shows the result-FIFO drain of these two tiny
    # matmuls on the critical path, rewrite them as unrolled VPU broadcast-FMAs
    # (8 + 4 taps); left as dots pending measurement (review: 5-15%, measure first).
    h3 = jnp.maximum(
        jnp.dot(w3T_ref[...], h2, preferred_element_type=jnp.float32)
        + b3_ref[...], 0.0)                                               # (win/4, TB)
    logits = (jnp.dot(w4T_ref[...], h3, preferred_element_type=jnp.float32)
              + b4_ref[...])                                              # (3, TB)

    # nn.Softmax() on a 2-D tensor == softmax over the class axis (sublanes).
    # Exact reciprocal so rows sum to 1 at f32 precision (essentially free).
    m = jnp.max(logits, axis=0, keepdims=True)
    e = jnp.exp(logits - m)
    inv = pl.reciprocal(jnp.sum(e, axis=0, keepdims=True), approx=False)
    out_ref[...] = e * inv


def fold_conv_into_fc1(params, H, win):
    """Fold Conv2d(1,3,(3,1)) into HiddenLayer1.

    feat[:, oc*win+p] = sum_k cw[oc,k]*x[:,p+k] + cb[oc]  (channel-major flatten)
    => (feat @ W1r + b1) == x @ W1_eff + b1_eff with
       W1_eff[h, j] = sum_{oc,k} cw[oc,k] * w1[oc, h-k, j]   (valid h-k)
       b1_eff[j]    = b1[j] + sum_{oc,p} cb[oc] * w1[oc, p, j]
    Must be recomputed whenever cw/cb/w1 change.
    """
    cw, cb, w1 = params["cw"], params["cb"], params["w1"]          # (3,3),(3,),(3,win,win)
    W1_eff = jnp.zeros((H, win), jnp.float32)
    for k in range(3):
        W1_eff = W1_eff.at[k:k + win, :].add(jnp.einsum("o,opj->pj", cw[:, k], w1))
    b1_eff = params["b1"][0] + jnp.einsum("o,opj->j", cb, w1)      # (win,)
    return W1_eff, b1_eff


def conv_network_forward(x_nchw, params, *, batch_tile=16384):
    """x_nchw: (B, 1, H, 1) float32, window = H - 2.  Returns (B, 3) softmax."""
    B, C, H, W = x_nchw.shape
    assert C == 1 and W == 1
    win = H - 2
    hid2, hid4 = win // 2, win // 4

    # conv folded into the first Linear; weights pre-transposed to (out, in).
    W1_eff, b1_eff = fold_conv_into_fc1(params, H, win)
    w1T, b1 = W1_eff.T, b1_eff[:, None]                            # (win,H), (win,1)
    w2T, b2 = params["w2"].T, params["b2"][0][:, None]             # (hid2,win), (hid2,1)
    w3T, b3 = params["w3"].T, params["b3"][0][:, None]             # (hid4,hid2), (hid4,1)
    w4T, b4 = params["w4"].T, params["b4"][0][:, None]             # (3,hid4), (3,1)
    weights = (w1T, b1, w2T, b2, w3T, b3, w4T, b4)

    # Natural HBM layout: (B,1,H,1) -> (B,H) is a free reshape.  No swapaxes,
    # no pad: grid = cdiv(B, TB) and Pallas clips the last block.
    x2d = x_nchw.reshape(B, H)

    TB = _choose_batch_tile(B, batch_tile)
    n_tiles = pl.cdiv(B, TB)

    # Resident weights: full-array blocks with constant index_map (no re-DMA).
    # pipeline_mode=pl.Buffered(1) would shave a few KiB of double-buffer
    # bookkeeping; left at the default for lowering robustness (minor).
    w_specs = [pl.BlockSpec(w.shape, lambda i: (0, 0)) for w in weights]

    flops = 2 * B * (win * H + hid2 * win + hid4 * hid2 + 3 * hid4)
    bytes_accessed = 4 * (H * B + 3 * B + sum(int(w.size) for w in weights))

    outT = pl.pallas_call(
        convnet_kernel,
        out_shape=jax.ShapeDtypeStruct((3, B), jnp.float32),
        grid=(n_tiles,),
        in_specs=[pl.BlockSpec((TB, H), lambda i: (i, 0))] + w_specs,
        out_specs=pl.BlockSpec((3, TB), lambda i: (0, i)),
        compiler_params=pltpu.CompilerParams(
            dimension_semantics=("parallel",),            # megacore on v7x
            vmem_limit_bytes=48 * 1024 * 1024),           # <= v7x's 64 MiB physical VMEM
        cost_estimate=pl.CostEstimate(
            flops=flops, transcendentals=4 * B, bytes_accessed=bytes_accessed),
    )(x2d, *weights)

    # (3, B) lane-dense kernel output; tiny (12*B byte) transpose back to the
    # torch (B, 3) convention -- consume outT directly to skip even that.
    return outT.T


def init_params(window, key):
    """Deterministic params matching ConvNetwork(window)'s shapes.
    Linear weights are stored pre-transposed as (in, out); W1 additionally
    reshaped to (3, window, window) to match the channel-major flatten order."""
    ks = jax.random.split(key, 10)

    def u(k, shape, fan_in):
        b = 1.0 / jnp.sqrt(jnp.float32(fan_in))
        return jax.random.uniform(k, shape, jnp.float32, -b, b)

    w, h2, h4 = window, window // 2, window // 4
    return {
        "cw": u(ks[0], (3, 3), 3),              # Conv2d(1,3,(3,1)) weight -> (out_ch, kh)
        "cb": u(ks[1], (3,), 3),
        "w1": u(ks[2], (3, w, w), 3 * w),       # Linear(3w, w) as (oc, p, out)
        "b1": u(ks[3], (1, w), 3 * w),
        "w2": u(ks[4], (w, h2), w),
        "b2": u(ks[5], (1, h2), w),
        "w3": u(ks[6], (h2, h4), h2),
        "b3": u(ks[7], (1, h4), h2),
        "w4": u(ks[8], (h4, 3), h4),
        "b4": u(ks[9], (1, 3), h4),
    }


def reference_forward(x_nchw, p):
    """Pure-JAX reference mirroring the torch forward exactly (no folding)."""
    B, _, H, _ = x_nchw.shape
    x = x_nchw[:, 0, :, 0]
    win = H - 2
    convs = []
    for oc in range(3):
        convs.append(p["cw"][oc, 0] * x[:, 0:win]
                     + p["cw"][oc, 1] * x[:, 1:win + 1]
                     + p["cw"][oc, 2] * x[:, 2:win + 2]
                     + p["cb"][oc])
    feat = jnp.concatenate(convs, axis=-1)                  # (B, 3*win), channel-major
    h1 = jax.nn.relu(feat @ p["w1"].reshape(3 * win, -1) + p["b1"])
    h2 = jax.nn.relu(h1 @ p["w2"] + p["b2"])
    h3 = jax.nn.relu(h2 @ p["w3"] + p["b3"])
    logits = h3 @ p["w4"] + p["b4"]
    return jax.nn.softmax(logits, axis=-1)


if __name__ == "__main__":
    window = 16                        # -> hidden sizes 16, 8, 4, output 3
    B, H = 2, window + 2               # torch input (B, 1, window+2, 1)

    key = jax.random.PRNGKey(0)
    k_x, k_p = jax.random.split(key)
    x = jax.random.normal(k_x, (B, 1, H, 1), jnp.float32)
    params = init_params(window, k_p)

    out = jax.block_until_ready(conv_network_forward(x, params))
    ref = reference_forward(x, params)

    assert out.shape == (B, 3)
    # tolerance covers MXU vs XLA default f32 matmul precision differences
    assert jnp.allclose(out, ref, atol=1e-3, rtol=1e-3), (out, ref)
    assert jnp.allclose(jnp.sum(out, axis=-1), 1.0, atol=1e-3)

    print("KERNEL_OK")
</pallas_src>

<mosaic_0001>
module attributes {stable_mosaic.version = 11 : i64} {
  func.func @convnet_kernel(%arg0: i32, %arg1: memref<128x18xf32, #tpu.memory_space<vmem>>, %arg2: memref<16x18xf32, #tpu.memory_space<vmem>>, %arg3: memref<16x1xf32, #tpu.memory_space<vmem>>, %arg4: memref<8x16xf32, #tpu.memory_space<vmem>>, %arg5: memref<8x1xf32, #tpu.memory_space<vmem>>, %arg6: memref<4x8xf32, #tpu.memory_space<vmem>>, %arg7: memref<4x1xf32, #tpu.memory_space<vmem>>, %arg8: memref<3x4xf32, #tpu.memory_space<vmem>>, %arg9: memref<3x1xf32, #tpu.memory_space<vmem>>, %arg10: memref<3x128xf32, #tpu.memory_space<vmem>>) attributes {dimension_semantics = [#tpu.dimension_semantics<parallel>], iteration_bounds = array<i64: 1>, scalar_prefetch = 0 : i64, scratch_operands = 0 : i64, tpu.core_type = #tpu.core_type<tc>, window_params = [{transform_indices = @transform_0, window_bounds = array<i64: 128, 18>}, {pipeline_mode = #tpu.pipeline_mode<synchronous>, transform_indices = @transform_1, window_bounds = array<i64: 16, 18>}, {pipeline_mode = #tpu.pipeline_mode<synchronous>, transform_indices = @transform_2, window_bounds = array<i64: 16, 1>}, {pipeline_mode = #tpu.pipeline_mode<synchronous>, transform_indices = @transform_3, window_bounds = array<i64: 8, 16>}, {pipeline_mode = #tpu.pipeline_mode<synchronous>, transform_indices = @transform_4, window_bounds = array<i64: 8, 1>}, {pipeline_mode = #tpu.pipeline_mode<synchronous>, transform_indices = @transform_5, window_bounds = array<i64: 4, 8>}, {pipeline_mode = #tpu.pipeline_mode<synchronous>, transform_indices = @transform_6, window_bounds = array<i64: 4, 1>}, {pipeline_mode = #tpu.pipeline_mode<synchronous>, transform_indices = @transform_7, window_bounds = array<i64: 3, 4>}, {pipeline_mode = #tpu.pipeline_mode<synchronous>, transform_indices = @transform_8, window_bounds = array<i64: 3, 1>}, {transform_indices = @transform_9, window_bounds = array<i64: 3, 128>}]} {
    %c0 = arith.constant 0 : index
    %c0_0 = arith.constant 0 : index
    %0 = vector.load %arg2[%c0, %c0_0] : memref<16x18xf32, #tpu.memory_space<vmem>>, vector<16x18xf32>
    %c0_1 = arith.constant 0 : index
    %c0_2 = arith.constant 0 : index
    %1 = vector.load %arg1[%c0_1, %c0_2] : memref<128x18xf32, #tpu.memory_space<vmem>>, vector<128x18xf32>
    %cst = arith.constant dense<0.000000e+00> : vector<16x128xf32>
    %2 = tpu.matmul %0, %1, %cst {dimension_numbers = #tpu.dot_dimension_numbers<[1], [1], [0], [0], [0, 0, 1, 0], [], []>} : vector<16x18xf32>, vector<128x18xf32>, vector<16x128xf32> -> vector<16x128xf32>
    %c0_3 = arith.constant 0 : index
    %c0_4 = arith.constant 0 : index
    %3 = vector.load %arg3[%c0_3, %c0_4] : memref<16x1xf32, #tpu.memory_space<vmem>>, vector<16x1xf32>
    %4 = vector.broadcast %3 : vector<16x1xf32> to vector<16x128xf32>
    %5 = arith.addf %2, %4 : vector<16x128xf32>
    %cst_5 = arith.constant 0.000000e+00 : f32
    %6 = vector.broadcast %cst_5 : f32 to vector<16x128xf32>
    %7 = arith.maximumf %5, %6 : vector<16x128xf32>
    %c0_6 = arith.constant 0 : index
    %c0_7 = arith.constant 0 : index
    %8 = vector.load %arg4[%c0_6, %c0_7] : memref<8x16xf32, #tpu.memory_space<vmem>>, vector<8x16xf32>
    %cst_8 = arith.constant dense<0.000000e+00> : vector<8x128xf32>
    %9 = tpu.matmul %8, %7, %cst_8 {dimension_numbers = #tpu.dot_dimension_numbers<[1], [0], [0], [1], [0, 0, 1, 1], [], []>} : vector<8x16xf32>, vector<16x128xf32>, vector<8x128xf32> -> vector<8x128xf32>
    %c0_9 = arith.constant 0 : index
    %c0_10 = arith.constant 0 : index
    %10 = vector.load %arg5[%c0_9, %c0_10] : memref<8x1xf32, #tpu.memory_space<vmem>>, vector<8x1xf32>
    %11 = vector.broadcast %10 : vector<8x1xf32> to vector<8x128xf32>
    %12 = arith.addf %9, %11 : vector<8x128xf32>
    %cst_11 = arith.constant 0.000000e+00 : f32
    %13 = vector.broadcast %cst_11 : f32 to vector<8x128xf32>
    %14 = arith.maximumf %12, %13 : vector<8x128xf32>
    %c0_12 = arith.constant 0 : index
    %c0_13 = arith.constant 0 : index
    %15 = vector.load %arg6[%c0_12, %c0_13] : memref<4x8xf32, #tpu.memory_space<vmem>>, vector<4x8xf32>
    %cst_14 = arith.constant dense<0.000000e+00> : vector<4x128xf32>
    %16 = tpu.matmul %15, %14, %cst_14 {dimension_numbers = #tpu.dot_dimension_numbers<[1], [0], [0], [1], [0, 0, 1, 1], [], []>} : vector<4x8xf32>, vector<8x128xf32>, vector<4x128xf32> -> vector<4x128xf32>
    %c0_15 = arith.constant 0 : index
    %c0_16 = arith.constant 0 : index
    %17 = vector.load %arg7[%c0_15, %c0_16] : memref<4x1xf32, #tpu.memory_space<vmem>>, vector<4x1xf32>
    %18 = vector.broadcast %17 : vector<4x1xf32> to vector<4x128xf32>
    %19 = arith.addf %16, %18 : vector<4x128xf32>
    %cst_17 = arith.constant 0.000000e+00 : f32
    %20 = vector.broadcast %cst_17 : f32 to vector<4x128xf32>
    %21 = arith.maximumf %19, %20 : vector<4x128xf32>
    %c0_18 = arith.constant 0 : index
    %c0_19 = arith.constant 0 : index
    %22 = vector.load %arg8[%c0_18, %c0_19] : memref<3x4xf32, #tpu.memory_space<vmem>>, vector<3x4xf32>
    %cst_20 = arith.constant dense<0.000000e+00> : vector<3x128xf32>
    %23 = tpu.matmul %22, %21, %cst_20 {dimension_numbers = #tpu.dot_dimension_numbers<[1], [0], [0], [1], [0, 0, 1, 1], [], []>} : vector<3x4xf32>, vector<4x128xf32>, vector<3x128xf32> -> vector<3x128xf32>
    %c0_21 = arith.constant 0 : index
    %c0_22 = arith.constant 0 : index
    %24 = vector.load %arg9[%c0_21, %c0_22] : memref<3x1xf32, #tpu.memory_space<vmem>>, vector<3x1xf32>
    %25 = vector.broadcast %24 : vector<3x1xf32> to vector<3x128xf32>
    %26 = arith.addf %23, %25 : vector<3x128xf32>
    %cst_23 = arith.constant dense<0xFF800000> : vector<128xf32>
    %27 = vector.multi_reduction <maximumf>, %26, %cst_23 [0] : vector<3x128xf32> to vector<128xf32>
    %28 = vector.shape_cast %27 : vector<128xf32> to vector<1x128xf32>
    %29 = vector.broadcast %28 : vector<1x128xf32> to vector<3x128xf32>
    %30 = arith.subf %26, %29 : vector<3x128xf32>
    %31 = math.exp %30 : vector<3x128xf32>
    %cst_24 = arith.constant dense<0.000000e+00> : vector<128xf32>
    %32 = vector.multi_reduction <add>, %31, %cst_24 [0] : vector<3x128xf32> to vector<128xf32>
    %33 = vector.shape_cast %32 : vector<128xf32> to vector<1x128xf32>
    %34 = tpu.reciprocal %33 : vector<1x128xf32> -> vector<1x128xf32>
    %35 = vector.broadcast %34 : vector<1x128xf32> to vector<3x128xf32>
    %36 = arith.mulf %31, %35 : vector<3x128xf32>
    %c0_25 = arith.constant 0 : index
    %c0_26 = arith.constant 0 : index
    %37 = vector.load %arg10[%c0_25, %c0_26] : memref<3x128xf32, #tpu.memory_space<vmem>>, vector<3x128xf32>
    tpu.vector_store %arg10[%c0_25, %c0_26], %36 {strides = array<i32>} : memref<3x128xf32, #tpu.memory_space<vmem>>, vector<3x128xf32>,
    return
  }
  func.func @transform_0(%arg0: i32) -> (i32, i32) {
    %c0_i32 = arith.constant 0 : i32
    %c0_i32_0 = arith.constant 0 : i32
    return %arg0, %c0_i32 : i32, i32
  }
  func.func @transform_1(%arg0: i32) -> (i32, i32) {
    %c0_i32 = arith.constant 0 : i32
    %c0_i32_0 = arith.constant 0 : i32
    %c0_i32_1 = arith.constant 0 : i32
    return %c0_i32, %c0_i32_0 : i32, i32
  }
  func.func @transform_2(%arg0: i32) -> (i32, i32) {
    %c0_i32 = arith.constant 0 : i32
    %c0_i32_0 = arith.constant 0 : i32
    %c0_i32_1 = arith.constant 0 : i32
    return %c0_i32, %c0_i32_0 : i32, i32
  }
  func.func @transform_3(%arg0: i32) -> (i32, i32) {
    %c0_i32 = arith.constant 0 : i32
    %c0_i32_0 = arith.constant 0 : i32
    %c0_i32_1 = arith.constant 0 : i32
    return %c0_i32, %c0_i32_0 : i32, i32
  }
  func.func @transform_4(%arg0: i32) -> (i32, i32) {
    %c0_i32 = arith.constant 0 : i32
    %c0_i32_0 = arith.constant 0 : i32
    %c0_i32_1 = arith.constant 0 : i32
    return %c0_i32, %c0_i32_0 : i32, i32
  }
  func.func @transform_5(%arg0: i32) -> (i32, i32) {
    %c0_i32 = arith.constant 0 : i32
    %c0_i32_0 = arith.constant 0 : i32
    %c0_i32_1 = arith.constant 0 : i32
    return %c0_i32, %c0_i32_0 : i32, i32
  }
  func.func @transform_6(%arg0: i32) -> (i32, i32) {
    %c0_i32 = arith.constant 0 : i32
    %c0_i32_0 = arith.constant 0 : i32
    %c0_i32_1 = arith.constant 0 : i32
    return %c0_i32, %c0_i32_0 : i32, i32
  }
  func.func @transform_7(%arg0: i32) -> (i32, i32) {
    %c0_i32 = arith.constant 0 : i32
    %c0_i32_0 = arith.constant 0 : i32
    %c0_i32_1 = arith.constant 0 : i32
    return %c0_i32, %c0_i32_0 : i32, i32
  }
  func.func @transform_8(%arg0: i32) -> (i32, i32) {
    %c0_i32 = arith.constant 0 : i32
    %c0_i32_0 = arith.constant 0 : i32
    %c0_i32_1 = arith.constant 0 : i32
    return %c0_i32, %c0_i32_0 : i32, i32
  }
  func.func @transform_9(%arg0: i32) -> (i32, i32) {
    %c0_i32 = arith.constant 0 : i32
    %c0_i32_0 = arith.constant 0 : i32
    return %c0_i32, %arg0 : i32, i32
  }
}

</mosaic_0001>

<bundles_post_ra>
// kernel: tpu_custom_call.1
= control target key start
LH: loop header
LB: loop body
LE: loop exit
PB: predicated region body
PF: predicated region fallthrough
CT: control target
= control target key end

     0   :  { %vm62_vm0 = vcmask 146432   ;;  %v576_v2 = vmov 0   ;;  %v577_v22 = vmov 0.0   ;;  %vm578_vm1 = vmmov 0   ;;  %s747_s0 = inlined_call_operand.vmem [shape: f32[2,18], index: 0, kind: input, shape index: {}]   ;;  %s748_s1 = inlined_call_operand.vmem [shape: f32[16,18], index: 1, kind: input, shape index: {}]   ;;  %s749_s2 = inlined_call_operand.vmem [shape: f32[16,1], index: 2, kind: input, shape index: {}]   ;;  %s750_s8 = inlined_call_operand.vmem [shape: f32[3,1], index: 8, kind: input, shape index: {}]   ;;  %s751_s4 = inlined_call_operand.vmem [shape: f32[8,1], index: 4, kind: input, shape index: {}]   ;;  %s752_s6 = inlined_call_operand.vmem [shape: f32[4,1], index: 6, kind: input, shape index: {}]   ;;  %s753_s3 = inlined_call_operand.vmem [shape: f32[8,16], index: 3, kind: input, shape index: {}]   ;;  %s754_s5 = inlined_call_operand.vmem [shape: f32[4,8], index: 5, kind: input, shape index: {}]   ;;  %s755_s7 = inlined_call_operand.vmem [shape: f32[3,4], index: 7, kind: input, shape index: {}]   ;;  %s756_s9 = inlined_call_operand.vmem [shape: f32[3,2], index: 9, kind: output, shape index: {}]  }
   0x1   :  { %v49_v0 = vld [vmem:[%s747_s0 + $0x78] sm:$0xff]  ;;  %v48_v1 = vld [vmem:[%s747_s0 + $0x70] sm:$0xff]  ;;  %570 = vset.pattern.permute.xlu0 %v576_v2  ;;  %571 = vset.pattern.permute.xlu1 %v576_v2  ;;  %v47_v3 = vld [vmem:[%s747_s0 + $0x68] sm:$0xff]  ;;  %vm201_vm2 = vcmask 130048   ;;  %vm283_vm3 = vcmask 64512   ;;  %vm369_vm4 = vcmask 1043456  }
   0x2   :  { %515 = vmatprep.subr.msk.mxu0 %vm62_vm0, %v49_v0  ;;  %v32_v4 = vld [vmem:[%s748_s1] sm:$0xff]  ;;  %v51_v5 = vld [vmem:[%s749_s2 + $0x8] sm:$0xff]  ;;  %v45_v8 = vld [vmem:[%s747_s0 + $0x58] sm:$0xff]  ;;  %550 = vmatprep.subr.mxu1 %v577_v22  ;;  %vm365_vm5 = vcmask 31744   ;;  %vm443_vm6 = vcmask 1042432  }
   0x3   :  { %516 = vmatpush3.xpose.msk.msra.mxu0 %vm62_vm0, %v49_v0  ;;  %547 = vmatprep.mubr.msk.f32.mxu0 %vm62_vm0, %v32_v4  ;;  %v46_v6 = vld [vmem:[%s747_s0 + $0x60] sm:$0xff]  ;;  %v44_v10 = vld [vmem:[%s747_s0 + $0x50] sm:$0xff]  ;;  %v43_v11 = vld [vmem:[%s747_s0 + $0x48] sm:$0xff] }
   0x4   :  { %517 = vmatprep.subr.msk.mxu0 %vm62_vm0, %v48_v1  ;;  %59 = vperm.xlu0 %570, %v51_v5   ;;  %v50_v7 = vld [vmem:[%s749_s2] sm:$0xff]  ;;  %v41_v13 = vld [vmem:[%s747_s0 + $0x38] sm:$0xff]  ;;  %v40_v14 = vld [vmem:[%s747_s0 + $0x30] sm:$0xff] }
   0x5   :  { %v359_v9 = vld [vmem:[%s750_s8] sm:$0x7]  ;;  %v39_v15 = vld [vmem:[%s747_s0 + $0x28] sm:$0xff]  ;;  %v37_v17 = vld [vmem:[%s747_s0 + $0x18] sm:$0xff]  ;;  %554 = vmatprep.mubr.msk.f32.mxu1 %vm578_vm1, %v577_v22 }
   0x6   :  { %v42_v12 = vld [vmem:[%s747_s0 + $0x40] sm:$0xff]  ;;  %v36_v18 = vld [vmem:[%s747_s0 + $0x10] sm:$0xff]  ;;  %v35_v19 = vld [vmem:[%s747_s0 + $0x8] sm:$0xff] }
   0x7   :  { %518 = vmatpush3.xpose.msk.msra.mxu0 %vm62_vm0, %v48_v1  ;;  %v38_v16 = vld [vmem:[%s747_s0 + $0x20] sm:$0xff]  ;;  %v33_v21 = vld [vmem:[%s748_s1 + $0x8] sm:$0xff] }
   0x8   :  { %519 = vmatprep.subr.msk.mxu0 %vm62_vm0, %v47_v3  ;;  %54 = vperm.xlu0 %570, %v50_v7   ;;  %v34_v20 = vld [vmem:[%s747_s0] sm:$0xff] }
   0x9   :  { %v195_v23 = vld [vmem:[%s751_s4] sm:$0xff] }
   0xa   :  { %198 = vperm.xlu1 %571, %v195_v23   ;;  %v277_v24 = vld [vmem:[%s752_s6] sm:$0xf] }
   0xb   :  { %520 = vmatpush3.xpose.msk.msra.mxu0 %vm62_vm0, %v47_v3  ;;  %v194_v33 = vld [vmem:[%s753_s3] sm:$0xff] }
   0xc   :  { %521 = vmatprep.subr.msk.mxu0 %vm62_vm0, %v46_v6  ;;  %362 = vperm.xlu0 %570, %v359_v9   ;;  %v276_v39 = vld [vmem:[%s754_s5] sm:$0xf] }
   0xd   :  { %v358_v45 = vld [vmem:[%s755_s7] sm:$0x7] }
   0xe   :  { %280 = vperm.xlu1 %571, %v277_v24  }
   0xf   :  { %522 = vmatpush3.xpose.msk.msra.mxu0 %vm62_vm0, %v46_v6 }
  0x10   :  { %523 = vmatprep.subr.msk.mxu0 %vm62_vm0, %v45_v8 }
  0x13   :  { %524 = vmatpush3.xpose.msk.msra.mxu0 %vm62_vm0, %v45_v8 }
  0x14   :  { %525 = vmatprep.subr.msk.mxu0 %vm62_vm0, %v44_v10 }
  0x17   :  { %526 = vmatpush3.xpose.msk.msra.mxu0 %vm62_vm0, %v44_v10 }
  0x18   :  { %527 = vmatprep.subr.msk.mxu0 %vm62_vm0, %v43_v11 }
  0x1b   :  { %528 = vmatpush3.xpose.msk.msra.mxu0 %vm62_vm0, %v43_v11 }
  0x1c   :  { %529 = vmatprep.subr.msk.mxu0 %vm62_vm0, %v42_v12 }
  0x1f   :  { %530 = vmatpush3.xpose.msk.msra.mxu0 %vm62_vm0, %v42_v12 }
  0x20   :  { %531 = vmatprep.subr.msk.mxu0 %vm62_vm0, %v41_v13 }
  0x23   :  { %532 = vmatpush3.xpose.msk.msra.mxu0 %vm62_vm0, %v41_v13 }
  0x24   :  { %533 = vmatprep.subr.msk.mxu0 %vm62_vm0, %v40_v14 }
  0x27   :  { %534 = vmatpush3.xpose.msk.msra.mxu0 %vm62_vm0, %v40_v14 }
  0x28   :  { %535 = vmatprep.subr.msk.mxu0 %vm62_vm0, %v39_v15 }
  0x2b   :  { %536 = vmatpush3.xpose.msk.msra.mxu0 %vm62_vm0, %v39_v15 }
  0x2c   :  { %537 = vmatprep.subr.msk.mxu0 %vm62_vm0, %v38_v16 }
  0x2f   :  { %538 = vmatpush3.xpose.msk.msra.mxu0 %vm62_vm0, %v38_v16 }
  0x30   :  { %539 = vmatprep.subr.msk.mxu0 %vm62_vm0, %v37_v17 }
  0x33   :  { %540 = vmatpush3.xpose.msk.msra.mxu0 %vm62_vm0, %v37_v17 }
  0x34   :  { %541 = vmatprep.subr.msk.mxu0 %vm62_vm0, %v36_v18 }
  0x37   :  { %542 = vmatpush3.xpose.msk.msra.mxu0 %vm62_vm0, %v36_v18 }
  0x38   :  { %543 = vmatprep.subr.msk.mxu0 %vm62_vm0, %v35_v19 }
  0x3b   :  { %544 = vmatpush3.xpose.msk.msra.mxu0 %vm62_vm0, %v35_v19 }
  0x3c   :  { %545 = vmatprep.subr.msk.mxu0 %vm62_vm0, %v34_v20 }
  0x3f   :  { %546 = vmatpush3.xpose.msk.msra.mxu0 %vm62_vm0, %v34_v20 }
  0x42   :  { %548 = vmatmul.mubr.msk.f32.vlgmr.msra.gmra.mxu0 %vm62_vm0, %v33_v21 }
  0x7f   :  { %v60_v25 = vpop.permute.xlu0 %59 }
  0x83   :  { %v55_v28 = vpop.permute.xlu0 %54 }
  0x85   :  { %v199_v34 = vpop.permute.xlu1 %198 }
  0x87   :  { %v363_v46 = vpop.permute.xlu0 %362 }
  0x89   :  { %v281_v40 = vpop.permute.xlu1 %280 }
 0x102   :  { %v549_v26 = vpop.f32.mrf.mxu0 }
 0x103   :  { %v189_v27 = vadd.f32 %v549_v26, %v60_v25 }
 0x104   :  { %v183_v29 = vpop.f32.mrf.mxu0 }
 0x105   :  { %v193_v30 = vmax.f32 %v189_v27, 0.0  ;;  %v184_v31 = vadd.f32 %v183_v29, %v55_v28 }
 0x107   :  { %v192_v32 = vmax.f32 %v184_v31, 0.0  ;;  %551 = vmatpush3.msra.mxu1 %v193_v30 }
 0x108   :  { %552 = vmatprep.subr.mxu1 %v577_v22 }
 0x109   :  { %553 = vmatpush3.msra.mxu1 %v192_v32 }
 0x10a   :  { %555 = vmatmul.mubr.msk.f32.vlgmr.msra.gmra.mxu1 %vm201_vm2, %v194_v33  ;;  %557 = vmatprep.subr.mxu1 %v577_v22 }
 0x10b   :  { %559 = vmatprep.mubr.msk.f32.mxu1 %vm578_vm1, %v577_v22 }
 0x1ca   :  { %v271_v35 = vpop.f32.mrf.mxu1 }
 0x1cb   :  { %v272_v36 = vadd.f32 %v271_v35, %v199_v34 }
 0x1cc   :  { %v556_v37 = vpop.f32.mrf.mxu1 }
 0x1cd   :  { %v275_v38 = vmax.f32 %v272_v36, 0.0 }
 0x1cf   :  { %558 = vmatpush3.msra.mxu1 %v275_v38 }
 0x1d0   :  { %560 = vmatmul.mubr.msk.f32.vlgmr.msra.gmra.mxu1 %vm283_vm3, %v276_v39  ;;  %562 = vmatprep.subr.mxu1 %v577_v22 }
 0x1d1   :  { %564 = vmatprep.mubr.msk.f32.mxu1 %vm578_vm1, %v577_v22 }
 0x290   :  { %v353_v41 = vpop.f32.mrf.mxu1 }
 0x291   :  { %v354_v42 = vadd.f32 %v353_v41, %v281_v40 }
 0x292   :  { %v561_v43 = vpop.f32.mrf.mxu1 }
 0x293   :  { %v357_v44 = vmax.f32 %v354_v42, 0.0 }
 0x295   :  { %563 = vmatpush3.msk.msra.mxu1 %vm369_vm4, %v357_v44 }
 0x296   :  { %565 = vmatmul.mubr.msk.f32.vlgmr.msra.gmra.mxu1 %vm365_vm5, %v358_v45 }
 0x356   :  { %v439_v47 = vpop.f32.mrf.mxu1 }
 0x357   :  { %v440_v48 = vadd.f32 %v439_v47, %v363_v46 }
 0x358   :  { %v566_v49 = vpop.f32.mrf.mxu1 }
 0x359   :  { %v444_v50 = vsel %vm443_vm6, %v440_v48, -inf }
 0x35a   :  { %v445_v51 = vrot.slane %v444_v50, 4 }
 0x35c   :  { %v446_v52 = vmax.f32 %v444_v50, %v445_v51 }
 0x35e   :  { %v447_v53 = vrot.slane %v446_v52, 2 }
 0x360   :  { %v448_v54 = vmax.f32 %v446_v52, %v447_v53 }
 0x362   :  { %v449_v55 = vrot.slane %v448_v54, 1 }
 0x364   :  { %v450_v56 = vmax.f32 %v448_v54, %v449_v55 }
 0x366   :  { %v451_v57 = vsub.f32 %v440_v48, %v450_v56 }
 0x368   :  { %v452_v58 = vmul.f32 1.442695, %v451_v57 }
 0x36a   :  { %572 = vpow2.f32 %v452_v58 }
 0x377   :  { %v573_v59 = vpop.eup %572 }
 0x378   :  { %v454_v60 = vsel %vm443_vm6, %v573_v59, 0.0 }
 0x379   :  { %v455_v61 = vrot.slane %v454_v60, 4 }
 0x37b   :  { %v456_v62 = vadd.f32 %v455_v61, %v454_v60 }
 0x37d   :  { %v457_v63 = vrot.slane %v456_v62, 2 }
 0x37f   :  { %v458_v0 = vadd.f32 %v457_v63, %v456_v62 }
 0x381   :  { %v459_v1 = vrot.slane %v458_v0, 1 }
 0x383   :  { %v460_v2 = vadd.f32 %v459_v1, %v458_v0 }
 0x385   :  { %574 = vrcp.f32 %v460_v2 }
 0x392   :  { %v575_v3 = vpop.eup %574 }
 0x393   :  { %v462_v4 = vmul.f32 %v575_v3, %v573_v59 }
 0x395   :  { %463 = vst [vmem:[%s756_s9] sm:$0x7] %v462_v4 }

</bundles_post_ra>
